<compile_context>
chip_gen: v7x
topology: tpu7x:2x2x1
jax: 0.10.0
libtpu: 0.0.40
codegen_flags: <defaults>
</compile_context>

<pallas_src>
import math
import jax
import jax.numpy as jnp
from jax.experimental import pallas as pl
from jax.experimental.pallas import tpu as pltpu

HIDDEN_DIM = 32
BIG_DIM = 1024            # fc5 output / fc6 input (fixed in the module)
LANE = 128                # TPU lane width
MAX_BATCH_TILE = 2048     # ~12.5 MiB live per step; fits 32 MiB scoped VMEM
SPLIT_THRESHOLD = 512     # batches >= this are split into >= 2 grid steps


def _round_up(n, m):
    return ((n + m - 1) // m) * m


def actor_kernel(x_ref,
                 w1_ref, b1_ref,
                 w2_ref, b2_ref,
                 w3_ref, b3_ref,
                 w5_ref, b5_ref,
                 w6_ref, b6_ref,
                 w4_ref, b4_ref,
                 out_ref):
    def linear(h, w_ref, b_ref):
        return jnp.dot(h, w_ref[...], preferred_element_type=jnp.float32) + b_ref[...]

    h = jnp.maximum(linear(x_ref[...], w1_ref, b1_ref), 0.0)   # fc1 + relu
    h = jnp.maximum(linear(h, w2_ref, b2_ref), 0.0)            # fc2 + relu
    h = jnp.maximum(linear(h, w3_ref, b3_ref), 0.0)            # fc3 + relu
    h = jnp.maximum(linear(h, w5_ref, b5_ref), 0.0)            # fc5 + relu
    h = jnp.maximum(linear(h, w6_ref, b6_ref), 0.0)            # fc6 + relu
    # (tanh(z) + 1) / 2 == sigmoid(2z); fc4 weights/bias are pre-scaled by 2
    # in the wrapper, so one EUP exp + divide replaces tanh + add + mul.
    z = linear(h, w4_ref, b4_ref)                              # (tile, 128) lane-dense
    y = 1.0 / (1.0 + jnp.exp(-z))
    out_ref[...] = y[:, :out_ref.shape[-1]]                    # slim (tile, action) store


def actor_forward(x, params, *, batch_tile=None):
    """Run the Actor forward pass via pallas_call.

    x: (B, state_dim) float32 (any B; padded internally).
    params: dict of (in, out)-layout weights and (1, out) biases.
    """
    B, state_dim = x.shape
    hidden = params["w1"].shape[1]
    big = params["w5"].shape[1]
    action_dim = params["w4"].shape[1]

    # Fold the "(tanh+1)/2" affine into a sigmoid: scale fc4 by 2 (free, at
    # trace time). Keep the fc4 matmul lane-dense by zero-padding its output
    # lanes to 128; only the first action_dim lanes are stored.
    lane_pad = _round_up(max(action_dim, LANE), LANE)
    w4 = 2.0 * params["w4"]
    b4 = 2.0 * params["b4"]
    if lane_pad != action_dim:
        w4 = jnp.pad(w4, ((0, 0), (0, lane_pad - action_dim)))
        b4 = jnp.pad(b4, ((0, 0), (0, lane_pad - action_dim)))

    # Batch tiling: one grid step for small batches (no pipeline overhead);
    # for larger batches pick the biggest tile (<= MAX_BATCH_TILE) that still
    # gives >= 2 grid steps, so per-step fixed overhead is amortized and both
    # v7x TensorCores get work.
    if batch_tile is None:
        b8 = _round_up(max(B, 8), 8)
        if b8 < SPLIT_THRESHOLD:
            batch_tile = b8
        else:
            batch_tile = min(MAX_BATCH_TILE, _round_up(pl.cdiv(b8, 2), 8))
    batch_tile = max(8, _round_up(batch_tile, 8))
    B_pad = _round_up(B, batch_tile)
    x_p = jnp.pad(x, ((0, B_pad - B), (0, 0))) if B_pad != B else x

    weight_args = [params["w1"], params["b1"], params["w2"], params["b2"],
                   params["w3"], params["b3"], params["w5"], params["b5"],
                   params["w6"], params["b6"], w4, b4]

    # Weights/biases: whole-array VMEM resident (no per-step DMA, no
    # double-buffering). Only x / out are pipelined over the batch grid.
    resident = pl.BlockSpec(memory_space=pltpu.MemorySpace.VMEM)
    in_specs = [pl.BlockSpec((batch_tile, state_dim), lambda i: (i, 0))]
    in_specs += [resident] * len(weight_args)
    # Slim output: action_dim is the full last dim of the output array, so a
    # (batch_tile, action_dim) block is legal; writeback is action_dim*4
    # bytes/row instead of 512, and no post-kernel slice pass is needed.
    out_specs = pl.BlockSpec((batch_tile, action_dim), lambda i: (i, 0))

    grid = (B_pad // batch_tile,)

    flops = 2 * B * (state_dim * hidden + 2 * hidden * hidden
                     + 2 * hidden * big + hidden * action_dim)
    bytes_accessed = 4 * (B * state_dim + sum(a.size for a in weight_args)
                          + B * action_dim)
    cost = pl.CostEstimate(flops=flops,
                           transcendentals=B * action_dim,
                           bytes_accessed=bytes_accessed)

    out = pl.pallas_call(
        actor_kernel,
        out_shape=jax.ShapeDtypeStruct((B_pad, action_dim), jnp.float32),
        grid_spec=pltpu.PrefetchScalarGridSpec(
            num_scalar_prefetch=0,
            grid=grid,
            in_specs=in_specs,
            out_specs=out_specs,
        ),
        compiler_params=pltpu.CompilerParams(
            dimension_semantics=("parallel",),
            vmem_limit_bytes=32 * 1024 * 1024,
        ),
        cost_estimate=cost,
    )(x_p, *weight_args)

    return out[:B] if B_pad != B else out


def init_linear(key, in_dim, out_dim):
    """Deterministic init matching nn.Linear's default U(-1/sqrt(in), 1/sqrt(in)).

    Returns weight in (in, out) layout (already transposed for the kernel)
    and bias as (1, out).
    """
    kw, kb = jax.random.split(key)
    bound = 1.0 / math.sqrt(in_dim)
    w = jax.random.uniform(kw, (in_dim, out_dim), jnp.float32, -bound, bound)
    b = jax.random.uniform(kb, (1, out_dim), jnp.float32, -bound, bound)
    return w, b


def init_actor_params(key, state_dim, action_dim, hidden_dim=HIDDEN_DIM):
    keys = jax.random.split(key, 6)
    w1, b1 = init_linear(keys[0], state_dim, hidden_dim)
    w2, b2 = init_linear(keys[1], hidden_dim, hidden_dim)
    w3, b3 = init_linear(keys[2], hidden_dim, hidden_dim)
    w4, b4 = init_linear(keys[3], hidden_dim, action_dim)
    w5, b5 = init_linear(keys[4], hidden_dim, BIG_DIM)
    w6, b6 = init_linear(keys[5], BIG_DIM, hidden_dim)
    return dict(w1=w1, b1=b1, w2=w2, b2=b2, w3=w3, b3=b3,
                w4=w4, b4=b4, w5=w5, b5=b5, w6=w6, b6=b6)


def actor_reference(x, p):
    h = jax.nn.relu(x @ p["w1"] + p["b1"])
    h = jax.nn.relu(h @ p["w2"] + p["b2"])
    h = jax.nn.relu(h @ p["w3"] + p["b3"])
    h = jax.nn.relu(h @ p["w5"] + p["b5"])
    h = jax.nn.relu(h @ p["w6"] + p["b6"])
    y = jnp.tanh(h @ p["w4"] + p["b4"])
    return (y + 1.0) / 2.0


if __name__ == "__main__":
    key = jax.random.PRNGKey(0)
    k_params, k_x, k_x2, k_x3 = jax.random.split(key, 4)

    batch = 8
    state_dim = 16
    action_dim = 4

    params = init_actor_params(k_params, state_dim, action_dim, HIDDEN_DIM)

    # Small batch: single-grid-step (no pipeline overhead) path.
    x = jax.random.normal(k_x, (batch, state_dim), jnp.float32)
    out = jax.block_until_ready(actor_forward(x, params))
    ref = actor_reference(x, params)
    assert out.shape == (batch, action_dim)
    assert jnp.allclose(out, ref, atol=1e-5, rtol=1e-5), "mismatch vs reference (small)"
    assert bool(jnp.all((out >= 0.0) & (out <= 1.0)))

    # Mid batch: exercises the auto >=2-grid-step split (256-row tiles here).
    x2 = jax.random.normal(k_x2, (512, state_dim), jnp.float32)
    out2 = jax.block_until_ready(actor_forward(x2, params))
    ref2 = actor_reference(x2, params)
    assert out2.shape == (512, action_dim)
    assert jnp.allclose(out2, ref2, atol=1e-5, rtol=1e-5), "mismatch vs reference (tiled)"

    # Uneven batch: exercises batch zero-padding with the split heuristic.
    x3 = jax.random.normal(k_x3, (1000, state_dim), jnp.float32)
    out3 = jax.block_until_ready(actor_forward(x3, params))
    ref3 = actor_reference(x3, params)
    assert out3.shape == (1000, action_dim)
    assert jnp.allclose(out3, ref3, atol=1e-5, rtol=1e-5), "mismatch vs reference (padded)"

    print("KERNEL_OK")
</pallas_src>

<mosaic_0001>
module attributes {stable_mosaic.version = 11 : i64} {
  func.func @actor_kernel(%arg0: i32, %arg1: memref<8x16xf32, #tpu.memory_space<vmem>>, %arg2: memref<16x32xf32, #tpu.memory_space<vmem>>, %arg3: memref<1x32xf32, #tpu.memory_space<vmem>>, %arg4: memref<32x32xf32, #tpu.memory_space<vmem>>, %arg5: memref<1x32xf32, #tpu.memory_space<vmem>>, %arg6: memref<32x32xf32, #tpu.memory_space<vmem>>, %arg7: memref<1x32xf32, #tpu.memory_space<vmem>>, %arg8: memref<32x1024xf32, #tpu.memory_space<vmem>>, %arg9: memref<1x1024xf32, #tpu.memory_space<vmem>>, %arg10: memref<1024x32xf32, #tpu.memory_space<vmem>>, %arg11: memref<1x32xf32, #tpu.memory_space<vmem>>, %arg12: memref<32x128xf32, #tpu.memory_space<vmem>>, %arg13: memref<1x128xf32, #tpu.memory_space<vmem>>, %arg14: memref<8x4xf32, #tpu.memory_space<vmem>>) attributes {dimension_semantics = [#tpu.dimension_semantics<parallel>], iteration_bounds = array<i64: 1>, scalar_prefetch = 0 : i64, scratch_operands = 0 : i64, tpu.core_type = #tpu.core_type<tc>, window_params = [{transform_indices = @transform_0, window_bounds = array<i64: 8, 16>}, {pipeline_mode = #tpu.pipeline_mode<synchronous>, transform_indices = @transform_1, window_bounds = array<i64: 16, 32>}, {pipeline_mode = #tpu.pipeline_mode<synchronous>, transform_indices = @transform_2, window_bounds = array<i64: 1, 32>}, {pipeline_mode = #tpu.pipeline_mode<synchronous>, transform_indices = @transform_3, window_bounds = array<i64: 32, 32>}, {pipeline_mode = #tpu.pipeline_mode<synchronous>, transform_indices = @transform_4, window_bounds = array<i64: 1, 32>}, {pipeline_mode = #tpu.pipeline_mode<synchronous>, transform_indices = @transform_5, window_bounds = array<i64: 32, 32>}, {pipeline_mode = #tpu.pipeline_mode<synchronous>, transform_indices = @transform_6, window_bounds = array<i64: 1, 32>}, {pipeline_mode = #tpu.pipeline_mode<synchronous>, transform_indices = @transform_7, window_bounds = array<i64: 32, 1024>}, {pipeline_mode = #tpu.pipeline_mode<synchronous>, transform_indices = @transform_8, window_bounds = array<i64: 1, 1024>}, {pipeline_mode = #tpu.pipeline_mode<synchronous>, transform_indices = @transform_9, window_bounds = array<i64: 1024, 32>}, {pipeline_mode = #tpu.pipeline_mode<synchronous>, transform_indices = @transform_10, window_bounds = array<i64: 1, 32>}, {pipeline_mode = #tpu.pipeline_mode<synchronous>, transform_indices = @transform_11, window_bounds = array<i64: 32, 128>}, {pipeline_mode = #tpu.pipeline_mode<synchronous>, transform_indices = @transform_12, window_bounds = array<i64: 1, 128>}, {transform_indices = @transform_13, window_bounds = array<i64: 8, 4>}]} {
    %c0 = arith.constant 0 : index
    %c0_0 = arith.constant 0 : index
    %0 = vector.load %arg1[%c0, %c0_0] : memref<8x16xf32, #tpu.memory_space<vmem>>, vector<8x16xf32>
    %c0_1 = arith.constant 0 : index
    %c0_2 = arith.constant 0 : index
    %1 = vector.load %arg2[%c0_1, %c0_2] : memref<16x32xf32, #tpu.memory_space<vmem>>, vector<16x32xf32>
    %cst = arith.constant dense<0.000000e+00> : vector<8x32xf32>
    %2 = tpu.matmul %0, %1, %cst {dimension_numbers = #tpu.dot_dimension_numbers<[1], [0], [0], [1], [0, 0, 1, 1], [], []>} : vector<8x16xf32>, vector<16x32xf32>, vector<8x32xf32> -> vector<8x32xf32>
    %c0_3 = arith.constant 0 : index
    %c0_4 = arith.constant 0 : index
    %3 = vector.load %arg3[%c0_3, %c0_4] : memref<1x32xf32, #tpu.memory_space<vmem>>, vector<1x32xf32>
    %4 = vector.broadcast %3 : vector<1x32xf32> to vector<8x32xf32>
    %5 = arith.addf %2, %4 : vector<8x32xf32>
    %cst_5 = arith.constant 0.000000e+00 : f32
    %6 = vector.broadcast %cst_5 : f32 to vector<8x32xf32>
    %7 = arith.maximumf %5, %6 : vector<8x32xf32>
    %c0_6 = arith.constant 0 : index
    %c0_7 = arith.constant 0 : index
    %8 = vector.load %arg4[%c0_6, %c0_7] : memref<32x32xf32, #tpu.memory_space<vmem>>, vector<32x32xf32>
    %cst_8 = arith.constant dense<0.000000e+00> : vector<8x32xf32>
    %9 = tpu.matmul %7, %8, %cst_8 {dimension_numbers = #tpu.dot_dimension_numbers<[1], [0], [0], [1], [0, 0, 1, 1], [], []>} : vector<8x32xf32>, vector<32x32xf32>, vector<8x32xf32> -> vector<8x32xf32>
    %c0_9 = arith.constant 0 : index
    %c0_10 = arith.constant 0 : index
    %10 = vector.load %arg5[%c0_9, %c0_10] : memref<1x32xf32, #tpu.memory_space<vmem>>, vector<1x32xf32>
    %11 = vector.broadcast %10 : vector<1x32xf32> to vector<8x32xf32>
    %12 = arith.addf %9, %11 : vector<8x32xf32>
    %cst_11 = arith.constant 0.000000e+00 : f32
    %13 = vector.broadcast %cst_11 : f32 to vector<8x32xf32>
    %14 = arith.maximumf %12, %13 : vector<8x32xf32>
    %c0_12 = arith.constant 0 : index
    %c0_13 = arith.constant 0 : index
    %15 = vector.load %arg6[%c0_12, %c0_13] : memref<32x32xf32, #tpu.memory_space<vmem>>, vector<32x32xf32>
    %cst_14 = arith.constant dense<0.000000e+00> : vector<8x32xf32>
    %16 = tpu.matmul %14, %15, %cst_14 {dimension_numbers = #tpu.dot_dimension_numbers<[1], [0], [0], [1], [0, 0, 1, 1], [], []>} : vector<8x32xf32>, vector<32x32xf32>, vector<8x32xf32> -> vector<8x32xf32>
    %c0_15 = arith.constant 0 : index
    %c0_16 = arith.constant 0 : index
    %17 = vector.load %arg7[%c0_15, %c0_16] : memref<1x32xf32, #tpu.memory_space<vmem>>, vector<1x32xf32>
    %18 = vector.broadcast %17 : vector<1x32xf32> to vector<8x32xf32>
    %19 = arith.addf %16, %18 : vector<8x32xf32>
    %cst_17 = arith.constant 0.000000e+00 : f32
    %20 = vector.broadcast %cst_17 : f32 to vector<8x32xf32>
    %21 = arith.maximumf %19, %20 : vector<8x32xf32>
    %c0_18 = arith.constant 0 : index
    %c0_19 = arith.constant 0 : index
    %22 = vector.load %arg8[%c0_18, %c0_19] : memref<32x1024xf32, #tpu.memory_space<vmem>>, vector<32x1024xf32>
    %cst_20 = arith.constant dense<0.000000e+00> : vector<8x1024xf32>
    %23 = tpu.matmul %21, %22, %cst_20 {dimension_numbers = #tpu.dot_dimension_numbers<[1], [0], [0], [1], [0, 0, 1, 1], [], []>} : vector<8x32xf32>, vector<32x1024xf32>, vector<8x1024xf32> -> vector<8x1024xf32>
    %c0_21 = arith.constant 0 : index
    %c0_22 = arith.constant 0 : index
    %24 = vector.load %arg9[%c0_21, %c0_22] : memref<1x1024xf32, #tpu.memory_space<vmem>>, vector<1x1024xf32>
    %25 = vector.broadcast %24 : vector<1x1024xf32> to vector<8x1024xf32>
    %26 = arith.addf %23, %25 : vector<8x1024xf32>
    %cst_23 = arith.constant 0.000000e+00 : f32
    %27 = vector.broadcast %cst_23 : f32 to vector<8x1024xf32>
    %28 = arith.maximumf %26, %27 : vector<8x1024xf32>
    %c0_24 = arith.constant 0 : index
    %c0_25 = arith.constant 0 : index
    %29 = vector.load %arg10[%c0_24, %c0_25] : memref<1024x32xf32, #tpu.memory_space<vmem>>, vector<1024x32xf32>
    %cst_26 = arith.constant dense<0.000000e+00> : vector<8x32xf32>
    %30 = tpu.matmul %28, %29, %cst_26 {dimension_numbers = #tpu.dot_dimension_numbers<[1], [0], [0], [1], [0, 0, 1, 1], [], []>} : vector<8x1024xf32>, vector<1024x32xf32>, vector<8x32xf32> -> vector<8x32xf32>
    %c0_27 = arith.constant 0 : index
    %c0_28 = arith.constant 0 : index
    %31 = vector.load %arg11[%c0_27, %c0_28] : memref<1x32xf32, #tpu.memory_space<vmem>>, vector<1x32xf32>
    %32 = vector.broadcast %31 : vector<1x32xf32> to vector<8x32xf32>
    %33 = arith.addf %30, %32 : vector<8x32xf32>
    %cst_29 = arith.constant 0.000000e+00 : f32
    %34 = vector.broadcast %cst_29 : f32 to vector<8x32xf32>
    %35 = arith.maximumf %33, %34 : vector<8x32xf32>
    %c0_30 = arith.constant 0 : index
    %c0_31 = arith.constant 0 : index
    %36 = vector.load %arg12[%c0_30, %c0_31] : memref<32x128xf32, #tpu.memory_space<vmem>>, vector<32x128xf32>
    %cst_32 = arith.constant dense<0.000000e+00> : vector<8x128xf32>
    %37 = tpu.matmul %35, %36, %cst_32 {dimension_numbers = #tpu.dot_dimension_numbers<[1], [0], [0], [1], [0, 0, 1, 1], [], []>} : vector<8x32xf32>, vector<32x128xf32>, vector<8x128xf32> -> vector<8x128xf32>
    %c0_33 = arith.constant 0 : index
    %c0_34 = arith.constant 0 : index
    %38 = vector.load %arg13[%c0_33, %c0_34] : memref<1x128xf32, #tpu.memory_space<vmem>>, vector<1x128xf32>
    %39 = vector.broadcast %38 : vector<1x128xf32> to vector<8x128xf32>
    %40 = arith.addf %37, %39 : vector<8x128xf32>
    %cst_35 = arith.constant 0.000000e+00 : f32
    %41 = vector.broadcast %cst_35 : f32 to vector<8x128xf32>
    %42 = arith.subf %41, %40 : vector<8x128xf32>
    %43 = math.exp %42 : vector<8x128xf32>
    %cst_36 = arith.constant 1.000000e+00 : f32
    %44 = vector.broadcast %cst_36 : f32 to vector<8x128xf32>
    %45 = arith.addf %44, %43 : vector<8x128xf32>
    %cst_37 = arith.constant 1.000000e+00 : f32
    %46 = vector.broadcast %cst_37 : f32 to vector<8x128xf32>
    %47 = arith.divf %46, %45 : vector<8x128xf32>
    %48 = vector.extract_strided_slice %47 {offsets = [0, 0], sizes = [8, 4], strides = [1, 1]} : vector<8x128xf32> to vector<8x4xf32>
    %c0_38 = arith.constant 0 : index
    %c0_39 = arith.constant 0 : index
    %49 = vector.load %arg14[%c0_38, %c0_39] : memref<8x4xf32, #tpu.memory_space<vmem>>, vector<8x4xf32>
    tpu.vector_store %arg14[%c0_38, %c0_39], %48 {strides = array<i32>} : memref<8x4xf32, #tpu.memory_space<vmem>>, vector<8x4xf32>,
    return
  }
  func.func @transform_0(%arg0: i32) -> (i32, i32) {
    %c0_i32 = arith.constant 0 : i32
    %c0_i32_0 = arith.constant 0 : i32
    return %arg0, %c0_i32 : i32, i32
  }
  func.func @transform_1(%arg0: i32) -> (i32, i32) {
    %c0_i32 = arith.constant 0 : i32
    %c0_i32_0 = arith.constant 0 : i32
    %c0_i32_1 = arith.constant 0 : i32
    return %c0_i32, %c0_i32_0 : i32, i32
  }
  func.func @transform_2(%arg0: i32) -> (i32, i32) {
    %c0_i32 = arith.constant 0 : i32
    %c0_i32_0 = arith.constant 0 : i32
    %c0_i32_1 = arith.constant 0 : i32
    return %c0_i32, %c0_i32_0 : i32, i32
  }
  func.func @transform_3(%arg0: i32) -> (i32, i32) {
    %c0_i32 = arith.constant 0 : i32
    %c0_i32_0 = arith.constant 0 : i32
    %c0_i32_1 = arith.constant 0 : i32
    return %c0_i32, %c0_i32_0 : i32, i32
  }
  func.func @transform_4(%arg0: i32) -> (i32, i32) {
    %c0_i32 = arith.constant 0 : i32
    %c0_i32_0 = arith.constant 0 : i32
    %c0_i32_1 = arith.constant 0 : i32
    return %c0_i32, %c0_i32_0 : i32, i32
  }
  func.func @transform_5(%arg0: i32) -> (i32, i32) {
    %c0_i32 = arith.constant 0 : i32
    %c0_i32_0 = arith.constant 0 : i32
    %c0_i32_1 = arith.constant 0 : i32
    return %c0_i32, %c0_i32_0 : i32, i32
  }
  func.func @transform_6(%arg0: i32) -> (i32, i32) {
    %c0_i32 = arith.constant 0 : i32
    %c0_i32_0 = arith.constant 0 : i32
    %c0_i32_1 = arith.constant 0 : i32
    return %c0_i32, %c0_i32_0 : i32, i32
  }
  func.func @transform_7(%arg0: i32) -> (i32, i32) {
    %c0_i32 = arith.constant 0 : i32
    %c0_i32_0 = arith.constant 0 : i32
    %c0_i32_1 = arith.constant 0 : i32
    return %c0_i32, %c0_i32_0 : i32, i32
  }
  func.func @transform_8(%arg0: i32) -> (i32, i32) {
    %c0_i32 = arith.constant 0 : i32
    %c0_i32_0 = arith.constant 0 : i32
    %c0_i32_1 = arith.constant 0 : i32
    return %c0_i32, %c0_i32_0 : i32, i32
  }
  func.func @transform_9(%arg0: i32) -> (i32, i32) {
    %c0_i32 = arith.constant 0 : i32
    %c0_i32_0 = arith.constant 0 : i32
    %c0_i32_1 = arith.constant 0 : i32
    return %c0_i32, %c0_i32_0 : i32, i32
  }
  func.func @transform_10(%arg0: i32) -> (i32, i32) {
    %c0_i32 = arith.constant 0 : i32
    %c0_i32_0 = arith.constant 0 : i32
    %c0_i32_1 = arith.constant 0 : i32
    return %c0_i32, %c0_i32_0 : i32, i32
  }
  func.func @transform_11(%arg0: i32) -> (i32, i32) {
    %c0_i32 = arith.constant 0 : i32
    %c0_i32_0 = arith.constant 0 : i32
    %c0_i32_1 = arith.constant 0 : i32
    return %c0_i32, %c0_i32_0 : i32, i32
  }
  func.func @transform_12(%arg0: i32) -> (i32, i32) {
    %c0_i32 = arith.constant 0 : i32
    %c0_i32_0 = arith.constant 0 : i32
    %c0_i32_1 = arith.constant 0 : i32
    return %c0_i32, %c0_i32_0 : i32, i32
  }
  func.func @transform_13(%arg0: i32) -> (i32, i32) {
    %c0_i32 = arith.constant 0 : i32
    %c0_i32_0 = arith.constant 0 : i32
    return %arg0, %c0_i32 : i32, i32
  }
}

</mosaic_0001>

<bundles_post_ra>
// kernel: tpu_custom_call.1
= control target key start
LH: loop header
LB: loop body
LE: loop exit
PB: predicated region body
PF: predicated region fallthrough
CT: control target
= control target key end

     0   :  { %v1580_v0 = vmov 0.0|0.0   ;;  %vm1581_vm0 = vmmov 0   ;;  %v1582_v3 = vmov 0.0   ;;  %vm54_vm1 = vcmask 130048   ;;  %s2251_s1 = inlined_call_operand.vmem [shape: f32[16,32], index: 1, kind: input, shape index: {}]   ;;  %s2252_s3 = inlined_call_operand.vmem [shape: f32[32,32], index: 3, kind: input, shape index: {}]   ;;  %s2253_s0 = inlined_call_operand.vmem [shape: f32[8,16], index: 0, kind: input, shape index: {}]   ;;  %s2254_s5 = inlined_call_operand.vmem [shape: f32[32,32], index: 5, kind: input, shape index: {}]   ;;  %s2255_s2 = inlined_call_operand.vmem [shape: f32[1,32], index: 2, kind: input, shape index: {}]   ;;  %s2256_s7 = inlined_call_operand.vmem [shape: f32[32,1024], index: 7, kind: input, shape index: {}]   ;;  %s2257_s4 = inlined_call_operand.vmem [shape: f32[1,32], index: 4, kind: input, shape index: {}]   ;;  %s2258_s6 = inlined_call_operand.vmem [shape: f32[1,32], index: 6, kind: input, shape index: {}]   ;;  %s2259_s9 = inlined_call_operand.vmem [shape: f32[1024,32], index: 9, kind: input, shape index: {}]   ;;  %s2260_s8 = inlined_call_operand.vmem [shape: f32[1,1024], index: 8, kind: input, shape index: {}]   ;;  %s2261_s11 = inlined_call_operand.vmem [shape: f32[32,128], index: 11, kind: input, shape index: {}]   ;;  %s2262_s10 = inlined_call_operand.vmem [shape: f32[1,32], index: 10, kind: input, shape index: {}]   ;;  %s2263_s12 = inlined_call_operand.vmem [shape: f32[1,128], index: 12, kind: input, shape index: {}]   ;;  %s2264_s13 = inlined_call_operand.vmem [shape: f32[8,4], index: 13, kind: output, shape index: {}]  }
   0x1   :  { %1392 = vmatprep.subr.bf16.mxu0 %v1580_v0  ;;  %v45_v1 = vld [vmem:[%s2251_s1] sm:$0xff]  ;;  %v46_v2 = vld [vmem:[%s2251_s1 + $0x8] sm:$0xff]  ;;  %1356 = vmatprep.mubr.msk.f32.mxu0 %vm1581_vm0, %v1582_v3  ;;  %v131_v9 = vld [vmem:[%s2252_s3 + $0x10] sm:$0xff]  ;;  %vm140_vm2 = vcmask 261120   ;;  %vm1175_vm3 = vcmask 31744  }
   0x2   :  { %v1393_v4 = vpack.c.bf16 %v46_v2, %v45_v1  ;;  %1395 = vmatprep.subr.bf16.mxu1 %v1580_v0  ;;  %v129_v5 = vld [vmem:[%s2252_s3] sm:$0xff]  ;;  %v130_v6 = vld [vmem:[%s2252_s3 + $0x8] sm:$0xff]  ;;  %1367 = vmatprep.mubr.msk.f32.mxu1 %vm1581_vm0, %v1582_v3  ;;  %v132_v10 = vld [vmem:[%s2252_s3 + $0x18] sm:$0xff] }
   0x3   :  { %v1396_v7 = vpack.c.bf16 %v130_v6, %v129_v5  ;;  %v44_v8 = vld [vmem:[%s2253_s0] sm:$0xff]  ;;  %v1399_v11 = vpack.c.bf16 %v132_v10, %v131_v9  ;;  %v216_v13 = vld [vmem:[%s2254_s5 + $0x8] sm:$0xff]  ;;  %v217_v20 = vld [vmem:[%s2254_s5 + $0x10] sm:$0xff] }
   0x4   :  { %1394 = vmatpush3.bf16.msra.mxu0 %v1393_v4  ;;  %v215_v12 = vld [vmem:[%s2254_s5] sm:$0xff]  ;;  %v218_v21 = vld [vmem:[%s2254_s5 + $0x18] sm:$0xff]  ;;  %v301_v23 = vld [vmem:[%s2256_s7 + $0x8] sm:$0xff] }
   0x5   :  { %1397 = vmatpush3.bf16.msra.mxu1 %v1396_v7  ;;  %1401 = vmatprep.subr.bf16.mxu0 %v1580_v0  ;;  %v1402_v14 = vpack.c.bf16 %v216_v13, %v215_v12  ;;  %v1181_v15 = vld [vmem:[%s2255_s2] ss:$0 sm:$0xff]  ;;  %v1405_v22 = vpack.c.bf16 %v218_v21, %v217_v20  ;;  %v309_v24 = vld [vmem:[%s2256_s7 + $0x48] sm:$0xff]  ;;  %v303_v25 = vld [vmem:[%s2256_s7 + $0x18] sm:$0xff] }
   0x6   :  { %1398 = vmatprep.subr.bf16.mxu1 %v1580_v0  ;;  %v1407_v26 = vpack.c.bf16 %v309_v24, %v301_v23  ;;  %v311_v27 = vld [vmem:[%s2256_s7 + $0x58] sm:$0xff]  ;;  %v300_v28 = vld [vmem:[%s2256_s7] sm:$0xff]  ;;  %v302_v33 = vld [vmem:[%s2256_s7 + $0x10] sm:$0xff] }
   0x7   :  { %1357 = vmatmul.mubr.msk.f32.vlgmr.msra.gmra.mrb[0].mxu0 %vm54_vm1, %v44_v8  ;;  %v308_v29 = vld [vmem:[%s2256_s7 + $0x40] sm:$0xff]  ;;  %v1415_v30 = vpack.c.bf16 %v311_v27, %v303_v25  ;;  %v310_v34 = vld [vmem:[%s2256_s7 + $0x50] sm:$0xff]  ;;  %v317_v40 = vld [vmem:[%s2256_s7 + $0x88] sm:$0xff] }
   0x8   :  { %1378 = vmatprep.mubr.msk.f32.mxu0 %vm1581_vm0, %v1582_v3  ;;  %1403 = vmatpush3.bf16.msra.mxu0 %v1402_v14  ;;  %v1409_v31 = vpack.c.bf16 %v308_v29, %v300_v28  ;;  %v1183_v32 = vld [vmem:[%s2257_s4] ss:$0 sm:$0xff]  ;;  %v1417_v38 = vpack.c.bf16 %v310_v34, %v302_v33  ;;  %v325_v41 = vld [vmem:[%s2256_s7 + $0xc8] sm:$0xff]  ;;  %v319_v42 = vld [vmem:[%s2256_s7 + $0x98] sm:$0xff] }
   0x9   :  { %1400 = vmatpush3.bf16.msra.mxu1 %v1399_v11  ;;  %1404 = vmatprep.subr.bf16.mxu0 %v1580_v0  ;;  %v1411_v43 = vpack.c.bf16 %v325_v41, %v317_v40  ;;  %v327_v44 = vld [vmem:[%s2256_s7 + $0xd8] sm:$0xff]  ;;  %v316_v45 = vld [vmem:[%s2256_s7 + $0x80] sm:$0xff]  ;;  %v318_v49 = vld [vmem:[%s2256_s7 + $0x90] sm:$0xff] }
   0xa   :  { %1408 = vmatprep.subr.bf16.mxu1 %v1407_v26  ;;  %v324_v46 = vld [vmem:[%s2256_s7 + $0xc0] sm:$0xff]  ;;  %v1419_v47 = vpack.c.bf16 %v327_v44, %v319_v42  ;;  %v326_v50 = vld [vmem:[%s2256_s7 + $0xd0] sm:$0xff]  ;;  %v305_v52 = vld [vmem:[%s2256_s7 + $0x28] sm:$0xff] }
   0xb   :  { %v1413_v48 = vpack.c.bf16 %v324_v46, %v316_v45  ;;  %v1421_v51 = vpack.c.bf16 %v326_v50, %v318_v49  ;;  %v313_v53 = vld [vmem:[%s2256_s7 + $0x68] sm:$0xff]  ;;  %v307_v54 = vld [vmem:[%s2256_s7 + $0x38] sm:$0xff]  ;;  %v1185_v58 = vld [vmem:[%s2258_s6] ss:$0 sm:$0xff] }
   0xc   :  { %1406 = vmatpush3.bf16.msra.mxu0 %v1405_v22  ;;  %v1423_v55 = vpack.c.bf16 %v313_v53, %v305_v52  ;;  %v315_v56 = vld [vmem:[%s2256_s7 + $0x78] sm:$0xff]  ;;  %v304_v59 = vld [vmem:[%s2256_s7 + $0x20] sm:$0xff]  ;;  %v306_v61 = vld [vmem:[%s2256_s7 + $0x30] sm:$0xff] }
   0xd   :  { %1416 = vmatprep.subr.bf16.mxu0 %v1415_v30  ;;  %v1431_v57 = vpack.c.bf16 %v315_v56, %v307_v54  ;;  %v312_v60 = vld [vmem:[%s2256_s7 + $0x60] sm:$0xff]  ;;  %v314_v62 = vld [vmem:[%s2256_s7 + $0x70] sm:$0xff]  ;;  %v321_v63 = vld [vmem:[%s2256_s7 + $0xa8] sm:$0xff] }
   0xe   :  { %v329_v2 = vld [vmem:[%s2256_s7 + $0xe8] sm:$0xff]  ;;  %v323_v4 = vld [vmem:[%s2256_s7 + $0xb8] sm:$0xff]  ;;  %v1425_v8 = vpack.c.bf16 %v312_v60, %v304_v59  ;;  %v1433_v9 = vpack.c.bf16 %v314_v62, %v306_v61  ;;  %v320_v10 = vld [vmem:[%s2256_s7 + $0xa0] sm:$0xff] }
   0xf   :  { %v331_v5 = vld [vmem:[%s2256_s7 + $0xf8] sm:$0xff]  ;;  %v328_v11 = vld [vmem:[%s2256_s7 + $0xe0] sm:$0xff]  ;;  %v1427_v13 = vpack.c.bf16 %v329_v2, %v321_v63  ;;  %v718_v20 = vld [vmem:[%s2259_s9 + $0x188] sm:$0xff] }
  0x10   :  { %v1435_v14 = vpack.c.bf16 %v331_v5, %v323_v4  ;;  %v1429_v21 = vpack.c.bf16 %v328_v11, %v320_v10  ;;  %v669_v23 = vld [vmem:[%s2259_s9] sm:$0xff]  ;;  %v670_v24 = vld [vmem:[%s2259_s9 + $0x8] sm:$0xff]  ;;  %v687_v29 = vld [vmem:[%s2259_s9 + $0x90] sm:$0xff] }
  0x11   :  { %v701_v27 = vld [vmem:[%s2259_s9 + $0x100] sm:$0xff]  ;;  %v702_v28 = vld [vmem:[%s2259_s9 + $0x108] sm:$0xff]  ;;  %v688_v30 = vld [vmem:[%s2259_s9 + $0x98] sm:$0xff]  ;;  %v1441_v33 = vpack.c.bf16 %v670_v24, %v669_v23 }
  0x12   :  { %v1473_v34 = vpack.c.bf16 %v702_v28, %v701_v27  ;;  %v704_v40 = vld [vmem:[%s2259_s9 + $0x118] sm:$0xff]  ;;  %v689_v41 = vld [vmem:[%s2259_s9 + $0xa0] sm:$0xff]  ;;  %v690_v42 = vld [vmem:[%s2259_s9 + $0xa8] sm:$0xff] }
  0x13   :  { %v722_v44 = vld [vmem:[%s2259_s9 + $0x1a8] sm:$0xff]  ;;  %v1447_v49 = vpack.c.bf16 %v690_v42, %v689_v41  ;;  %v691_v53 = vld [vmem:[%s2259_s9 + $0xb0] sm:$0xff]  ;;  %v692_v54 = vld [vmem:[%s2259_s9 + $0xb8] sm:$0xff] }
  0x14   :  { %v706_v52 = vld [vmem:[%s2259_s9 + $0x128] sm:$0xff]  ;;  %v724_v56 = vld [vmem:[%s2259_s9 + $0x1b8] sm:$0xff]  ;;  %v675_v59 = vld [vmem:[%s2259_s9 + $0x30] sm:$0xff]  ;;  %v1451_v61 = vpack.c.bf16 %v692_v54, %v691_v53 }
  0x15   :  { %v676_v60 = vld [vmem:[%s2259_s9 + $0x38] sm:$0xff]  ;;  %v707_v63 = vld [vmem:[%s2259_s9 + $0x130] sm:$0xff]  ;;  %v693_v2 = vld [vmem:[%s2259_s9 + $0xc0] sm:$0xff] }
  0x16   :  { %v694_v4 = vld [vmem:[%s2259_s9 + $0xc8] sm:$0xff]  ;;  %v725_v5 = vld [vmem:[%s2259_s9 + $0x1c0] sm:$0xff]  ;;  %v699_v41 = vld [vmem:[%s2259_s9 + $0xf0] sm:$0xff] }
  0x17   :  { %v678_v10 = vld [vmem:[%s2259_s9 + $0x48] sm:$0xff]  ;;  %v1455_v11 = vpack.c.bf16 %v694_v4, %v693_v2  ;;  %v697_v27 = vld [vmem:[%s2259_s9 + $0xe0] sm:$0xff]  ;;  %v700_v42 = vld [vmem:[%s2259_s9 + $0xf8] sm:$0xff] }
  0x18   :  { %v698_v28 = vld [vmem:[%s2259_s9 + $0xe8] sm:$0xff]  ;;  %v749_v53 = vld [vmem:[%s2259_s9 + $0x280] sm:$0xff] }
  0x19   :  { %v750_v54 = vld [vmem:[%s2259_s9 + $0x288] sm:$0xff] }
  0xda   :  { %v124_v16 = vpop.f32.mrb[0].mxu0 }
  0xdb   :  { %v125_v17 = vadd.f32 %v1181_v15, %v124_v16  ;;  %v1358_v18 = vpop.f32.mrb[1].mxu0  ;;  %v322_v15 = vld [vmem:[%s2256_s7 + $0xb0] sm:$0xff] }
  0xdc   :  { %v330_v16 = vld [vmem:[%s2256_s7 + $0xf0] sm:$0xff]  ;;  %v686_v18 = vld [vmem:[%s2259_s9 + $0x88] sm:$0xff] }
  0xdd   :  { %v128_v19 = vmax.f32 %v125_v17, 0.0  ;;  %v685_v17 = vld [vmem:[%s2259_s9 + $0x80] sm:$0xff]  ;;  %v1437_v22 = vpack.c.bf16 %v330_v16, %v322_v15  ;;  %v695_v15 = vld [vmem:[%s2259_s9 + $0xd0] sm:$0xff]  ;;  %v696_v16 = vld [vmem:[%s2259_s9 + $0xd8] sm:$0xff] }
  0xde   :  { %v1439_v25 = vpack.c.bf16 %v686_v18, %v685_v17  ;;  %v727_v17 = vld [vmem:[%s2259_s9 + $0x1d0] sm:$0xff]  ;;  %v728_v18 = vld [vmem:[%s2259_s9 + $0x1d8] sm:$0xff]  ;;  %v1459_v23 = vpack.c.bf16 %v696_v16, %v695_v15  ;;  %v765_v16 = vld [vmem:[%s2259_s9 + $0x300] sm:$0xff] }
  0xdf   :  { %1368 = vmatmul.mubr.msk.f32.vlgmr.msra.gmra.mrb[0].mxu1 %vm140_vm2, %v128_v19  ;;  %v717_v19 = vld [vmem:[%s2259_s9 + $0x180] sm:$0xff]  ;;  %v1491_v24 = vpack.c.bf16 %v728_v18, %v727_v17  ;;  %v766_v17 = vld [vmem:[%s2259_s9 + $0x308] sm:$0xff]  ;;  %v751_v18 = vld [vmem:[%s2259_s9 + $0x290] sm:$0xff] }
  0xe0   :  { %441 = vmatprep.mubr.f32.mxu1 %v1582_v3  ;;  %1410 = vmatpush1.bf16.msra.mxu1 %v1409_v31  ;;  %v1471_v26 = vpack.c.bf16 %v718_v20, %v717_v19  ;;  %v719_v31 = vld [vmem:[%s2259_s9 + $0x190] sm:$0xff] }
  0xe1   :  { %1412 = vmatprep.subr.bf16.mxu1 %v1411_v43  ;;  %v721_v43 = vld [vmem:[%s2259_s9 + $0x1a0] sm:$0xff] }
  0xe2   :  { %v1479_v50 = vpack.c.bf16 %v722_v44, %v721_v43  ;;  %v731_v43 = vld [vmem:[%s2259_s9 + $0x1f0] sm:$0xff]  ;;  %v1467_v44 = vpack.c.bf16 %v700_v42, %v699_v41  ;;  %v754_v41 = vld [vmem:[%s2259_s9 + $0x2a8] sm:$0xff]  ;;  %v785_v42 = vld [vmem:[%s2259_s9 + $0x3a0] sm:$0xff] }
  0xe4   :  { %1414 = vmatpush1.bf16.msra.mxu1 %v1413_v48  ;;  %v674_v48 = vld [vmem:[%s2259_s9 + $0x28] sm:$0xff] }
  0xe5   :  { %1424 = vmatprep.subr.bf16.mxu1 %v1423_v55  ;;  %v723_v55 = vld [vmem:[%s2259_s9 + $0x1b0] sm:$0xff] }
  0xe6   :  { %v1483_v62 = vpack.c.bf16 %v724_v56, %v723_v55  ;;  %v781_v55 = vld [vmem:[%s2259_s9 + $0x380] sm:$0xff]  ;;  %v1503_v56 = vpack.c.bf16 %v750_v54, %v749_v53 }
  0xe7   :  { %v769_v54 = vld [vmem:[%s2259_s9 + $0x320] sm:$0xff] }
 0x1b2   :  { %v210_v35 = vpop.f32.mrb[0].mxu1 }
 0x1b3   :  { %v211_v36 = vadd.f32 %v1183_v32, %v210_v35  ;;  %v1369_v37 = vpop.f32.mrb[1].mxu1  ;;  %v720_v32 = vld [vmem:[%s2259_s9 + $0x198] sm:$0xff]  ;;  %v671_v35 = vld [vmem:[%s2259_s9 + $0x10] sm:$0xff] }
 0x1b4   :  { %v1443_v37 = vpack.c.bf16 %v688_v30, %v687_v29  ;;  %v729_v29 = vld [vmem:[%s2259_s9 + $0x1e0] sm:$0xff]  ;;  %v730_v30 = vld [vmem:[%s2259_s9 + $0x1e8] sm:$0xff] }
 0x1b5   :  { %v214_v39 = vmax.f32 %v211_v36, 0.0  ;;  %v672_v36 = vld [vmem:[%s2259_s9 + $0x18] sm:$0xff] }
 0x1b6   :  { %v1445_v45 = vpack.c.bf16 %v672_v36, %v671_v35  ;;  %v1495_v35 = vpack.c.bf16 %v730_v30, %v729_v29  ;;  %v682_v36 = vld [vmem:[%s2259_s9 + $0x68] sm:$0xff]  ;;  %v1537_v29 = vpack.c.bf16 %v766_v17, %v765_v16  ;;  %v735_v30 = vld [vmem:[%s2259_s9 + $0x210] sm:$0xff] }
 0x1b7   :  { %1379 = vmatmul.mubr.msk.f32.vlgmr.msra.gmra.mrb[2].mxu0 %vm140_vm2, %v214_v39  ;;  %v703_v39 = vld [vmem:[%s2259_s9 + $0x110] sm:$0xff] }
 0x1b8   :  { %1418 = vmatpush1.bf16.msra.mxu0 %v1417_v38  ;;  %512 = vmatprep.mubr.f32.mxu0 %v1582_v3  ;;  %v1475_v38 = vpack.c.bf16 %v720_v32, %v719_v31  ;;  %v1477_v46 = vpack.c.bf16 %v704_v40, %v703_v39 }
 0x1b9   :  { %1420 = vmatprep.subr.bf16.mxu0 %v1419_v47  ;;  %v673_v47 = vld [vmem:[%s2259_s9 + $0x20] sm:$0xff] }
 0x1bc   :  { %1422 = vmatpush1.bf16.msra.mxu0 %v1421_v51  ;;  %v705_v51 = vld [vmem:[%s2259_s9 + $0x120] sm:$0xff] }
 0x1bd   :  { %1432 = vmatprep.subr.bf16.mxu0 %v1431_v57  ;;  %v1449_v57 = vpack.c.bf16 %v674_v48, %v673_v47  ;;  %v684_v47 = vld [vmem:[%s2259_s9 + $0x78] sm:$0xff] }
 0x28a   :  { %v295_v1 = vpop.f32.mrb[2].mxu0 }
 0x28b   :  { %v296_v6 = vadd.f32 %v1185_v58, %v295_v1  ;;  %v1380_v7 = vpop.f32.mrb[3].mxu0  ;;  %v1481_v58 = vpack.c.bf16 %v706_v52, %v705_v51  ;;  %v708_v1 = vld [vmem:[%s2259_s9 + $0x138] sm:$0xff] }
 0x28c   :  { %v1453_v7 = vpack.c.bf16 %v676_v60, %v675_v59  ;;  %v716_v51 = vld [vmem:[%s2259_s9 + $0x178] sm:$0xff]  ;;  %v334_v59 = vlaneseq }
 0x28d   :  { %v299_v12 = vmax.f32 %v296_v6, 0.0  ;;  %v726_v6 = vld [vmem:[%s2259_s9 + $0x1c8] sm:$0xff] }
 0x28e   :  { %v2016_v60 = vshrl.u32 %v334_v59, 7  ;;  %v756_v59 = vld [vmem:[%s2259_s9 + $0x2b8] sm:$0xff] }
 0x28f   :  { %1187 = vmatmul.mubr.msk.f32.vlgmr.msra.gmra.mrb[2].mxu1 %vm140_vm2, %v299_v12  ;;  %1188 = vmatmul.mubr.msk.f32.vlgmr.msra.gmra.mrb[4].mxu0 %vm140_vm2, %v299_v12 }
 0x290   :  { %1426 = vmatpush1.bf16.msra.mxu1 %v1425_v8  ;;  %1434 = vmatpush1.bf16.msra.mxu0 %v1433_v9  ;;  %v1485_v8 = vpack.c.bf16 %v708_v1, %v707_v63  ;;  %v677_v9 = vld [vmem:[%s2259_s9 + $0x40] sm:$0xff]  ;;  %v340_v1 = vsub.s32 1, %v2016_v60  ;;  %v348_v2 = vsub.s32 3, %v2016_v60 }
 0x291   :  { %1428 = vmatprep.subr.bf16.mxu1 %v1427_v13  ;;  %1436 = vmatprep.subr.bf16.mxu0 %v1435_v14  ;;  %v709_v13 = vld [vmem:[%s2259_s9 + $0x140] sm:$0xff]  ;;  %v710_v14 = vld [vmem:[%s2259_s9 + $0x148] sm:$0xff]  ;;  %v1457_v19 = vpack.c.bf16 %v678_v10, %v677_v9 }
 0x292   :  { %583 = vmatprep.mubr.f32.mxu1 %v1582_v3  ;;  %654 = vmatprep.mubr.f32.mxu0 %v1582_v3  ;;  %v1489_v20 = vpack.c.bf16 %v710_v14, %v709_v13  ;;  %v2023_v63 = vld [vmem:[%s2260_s8] sm:$0xff] }
 0x293   :  { %v733_v10 = vld [vmem:[%s2259_s9 + $0x200] sm:$0xff] }
 0x294   :  { %1430 = vmatpush1.bf16.msra.mxu1 %v1429_v21  ;;  %1438 = vmatpush1.bf16.msra.mxu0 %v1437_v22  ;;  %v679_v21 = vld [vmem:[%s2259_s9 + $0x50] sm:$0xff]  ;;  %v680_v22 = vld [vmem:[%s2259_s9 + $0x58] sm:$0xff] }
 0x295   :  { %1440 = vmatprep.subr.bf16.mxu1 %v1439_v25  ;;  %1472 = vmatprep.subr.bf16.mxu0 %v1471_v26  ;;  %v711_v25 = vld [vmem:[%s2259_s9 + $0x150] sm:$0xff]  ;;  %v712_v26 = vld [vmem:[%s2259_s9 + $0x158] sm:$0xff]  ;;  %v1461_v31 = vpack.c.bf16 %v680_v22, %v679_v21  ;;  %v356_v21 = vsub.s32 5, %v2016_v60  ;;  %v364_v22 = vsub.s32 7, %v2016_v60 }
 0x296   :  { %v1493_v32 = vpack.c.bf16 %v712_v26, %v711_v25  ;;  %v784_v25 = vld [vmem:[%s2259_s9 + $0x398] sm:$0xff] }
 0x297   :  { %1189 = vmatmul.mubr.msk.f32.vlgmr.msra.gmra.mrb[4].mxu1 %vm140_vm2, %v299_v12  ;;  %1190 = vmatmul.mubr.msk.f32.vlgmr.msra.gmra.mrb[6].mxu0 %vm140_vm2, %v299_v12  ;;  %v1487_v12 = vpack.c.bf16 %v726_v6, %v725_v5  ;;  %v341_v6 = vrot.slane %v2023_v63, %v340_v1 }
 0x298   :  { %1442 = vmatpush3.bf16.msra.mxu1 %v1441_v33  ;;  %1474 = vmatpush3.bf16.msra.mxu0 %v1473_v34  ;;  %v681_v33 = vld [vmem:[%s2259_s9 + $0x60] sm:$0xff]  ;;  %v1463_v34 = vpack.c.bf16 %v698_v28, %v697_v27 }
 0x299   :  { %1444 = vmatprep.subr.bf16.mxu1 %v1443_v37  ;;  %1476 = vmatprep.subr.bf16.mxu0 %v1475_v38  ;;  %v713_v37 = vld [vmem:[%s2259_s9 + $0x160] sm:$0xff]  ;;  %v714_v38 = vld [vmem:[%s2259_s9 + $0x168] sm:$0xff]  ;;  %v1465_v39 = vpack.c.bf16 %v682_v36, %v681_v33  ;;  %v767_v36 = vld [vmem:[%s2259_s9 + $0x310] sm:$0xff] }
 0x29a   :  { %v1497_v40 = vpack.c.bf16 %v714_v38, %v713_v37  ;;  %v768_v37 = vld [vmem:[%s2259_s9 + $0x318] sm:$0xff]  ;;  %v753_v38 = vld [vmem:[%s2259_s9 + $0x2a0] sm:$0xff] }
 0x29c   :  { %1446 = vmatpush3.bf16.msra.mxu1 %v1445_v45  ;;  %1478 = vmatpush3.bf16.msra.mxu0 %v1477_v46  ;;  %v732_v45 = vld [vmem:[%s2259_s9 + $0x1f8] sm:$0xff]  ;;  %v683_v46 = vld [vmem:[%s2259_s9 + $0x70] sm:$0xff] }
 0x29d   :  { %1448 = vmatprep.subr.bf16.mxu1 %v1447_v49  ;;  %1480 = vmatprep.subr.bf16.mxu0 %v1479_v50  ;;  %v1499_v48 = vpack.c.bf16 %v732_v45, %v731_v43  ;;  %v1469_v49 = vpack.c.bf16 %v684_v47, %v683_v46  ;;  %v715_v50 = vld [vmem:[%s2259_s9 + $0x170] sm:$0xff]  ;;  %v786_v43 = vld [vmem:[%s2259_s9 + $0x3a8] sm:$0xff]  ;;  %v1541_v47 = vpack.c.bf16 %v768_v37, %v767_v36  ;;  %v761_v36 = vld [vmem:[%s2259_s9 + $0x2e0] sm:$0xff] }
 0x29e   :  { %v1501_v52 = vpack.c.bf16 %v716_v51, %v715_v50  ;;  %v1543_v53 = vpack.c.bf16 %v786_v43, %v785_v42  ;;  %v762_v37 = vld [vmem:[%s2259_s9 + $0x2e8] sm:$0xff]  ;;  %v745_v43 = vld [vmem:[%s2259_s9 + $0x260] sm:$0xff] }
 0x2a0   :  { %1450 = vmatpush3.bf16.msra.mxu1 %v1449_v57  ;;  %1482 = vmatpush3.bf16.msra.mxu0 %v1481_v58  ;;  %v782_v57 = vld [vmem:[%s2259_s9 + $0x388] sm:$0xff] }
 0x2a1   :  { %1452 = vmatprep.subr.bf16.mxu1 %v1451_v61  ;;  %1484 = vmatprep.subr.bf16.mxu0 %v1483_v62  ;;  %v1535_v58 = vpack.c.bf16 %v782_v57, %v781_v55  ;;  %v336_v61 = vsub.s32 0, %v2016_v60  ;;  %v344_v62 = vsub.s32 2, %v2016_v60  ;;  %v770_v55 = vld [vmem:[%s2259_s9 + $0x328] sm:$0xff] }
 0x2a3   :  { %v337_v4 = vrot.slane %v2023_v63, %v336_v61  ;;  %v345_v5 = vrot.slane %v2023_v63, %v344_v62  ;;  %v787_v61 = vld [vmem:[%s2259_s9 + $0x3b0] sm:$0xff]  ;;  %v788_v62 = vld [vmem:[%s2259_s9 + $0x3b8] sm:$0xff] }
 0x2a4   :  { %1454 = vmatpush3.bf16.msra.mxu1 %v1453_v7  ;;  %1486 = vmatpush3.bf16.msra.mxu0 %v1485_v8  ;;  %v349_v7 = vrot.slane %v2023_v63, %v348_v2 }
 0x2a5   :  { %1456 = vmatprep.subr.bf16.mxu1 %v1455_v11  ;;  %1488 = vmatprep.subr.bf16.mxu0 %v1487_v12  ;;  %v734_v11 = vld [vmem:[%s2259_s9 + $0x208] sm:$0xff] }
 0x2a6   :  { %v1505_v28 = vpack.c.bf16 %v734_v11, %v733_v10  ;;  %v771_v10 = vld [vmem:[%s2259_s9 + $0x330] sm:$0xff]  ;;  %v772_v11 = vld [vmem:[%s2259_s9 + $0x338] sm:$0xff] }
 0x2a7   :  { %v1549_v17 = vpack.c.bf16 %v772_v11, %v771_v10  ;;  %v1085_v10 = vld [vmem:[%s2261_s11] sm:$0xff]  ;;  %v1087_v11 = vld [vmem:[%s2261_s11 + $0x10] sm:$0xff] }
 0x2a8   :  { %1458 = vmatpush3.bf16.msra.mxu1 %v1457_v19  ;;  %1490 = vmatpush3.bf16.msra.mxu0 %v1489_v20 }
 0x2a9   :  { %1460 = vmatprep.subr.bf16.mxu1 %v1459_v23  ;;  %1492 = vmatprep.subr.bf16.mxu0 %v1491_v24  ;;  %v752_v23 = vld [vmem:[%s2259_s9 + $0x298] sm:$0xff]  ;;  %v783_v24 = vld [vmem:[%s2259_s9 + $0x390] sm:$0xff] }
 0x2ac   :  { %1462 = vmatpush3.bf16.msra.mxu1 %v1461_v31  ;;  %1494 = vmatpush3.bf16.msra.mxu0 %v1493_v32  ;;  %v736_v31 = vld [vmem:[%s2259_s9 + $0x218] sm:$0xff] }
 0x2ad   :  { %1464 = vmatprep.subr.bf16.mxu1 %v1463_v34  ;;  %1496 = vmatprep.subr.bf16.mxu0 %v1495_v35  ;;  %v1507_v34 = vpack.c.bf16 %v752_v23, %v751_v18  ;;  %v1539_v35 = vpack.c.bf16 %v784_v25, %v783_v24  ;;  %v1509_v46 = vpack.c.bf16 %v736_v31, %v735_v30  ;;  %v741_v18 = vld [vmem:[%s2259_s9 + $0x240] sm:$0xff]  ;;  %v774_v23 = vld [vmem:[%s2259_s9 + $0x348] sm:$0xff]  ;;  %v759_v24 = vld [vmem:[%s2259_s9 + $0x2d0] sm:$0xff] }
 0x2ae   :  { %v760_v25 = vld [vmem:[%s2259_s9 + $0x2d8] sm:$0xff]  ;;  %v743_v30 = vld [vmem:[%s2259_s9 + $0x250] sm:$0xff] }
 0x2af   :  { %v744_v31 = vld [vmem:[%s2259_s9 + $0x258] sm:$0xff] }
 0x2b0   :  { %1466 = vmatpush3.bf16.msra.mxu1 %v1465_v39  ;;  %1498 = vmatpush3.bf16.msra.mxu0 %v1497_v40  ;;  %v357_v39 = vrot.slane %v2023_v63, %v356_v21  ;;  %v365_v40 = vrot.slane %v2023_v63, %v364_v22  ;;  %v773_v22 = vld [vmem:[%s2259_s9 + $0x340] sm:$0xff] }
 0x2b1   :  { %1468 = vmatprep.subr.bf16.mxu1 %v1467_v44  ;;  %1500 = vmatprep.subr.bf16.mxu0 %v1499_v48  ;;  %v737_v48 = vld [vmem:[%s2259_s9 + $0x220] sm:$0xff] }
 0x2b4   :  { %1470 = vmatpush3.bf16.msra.mxu1 %v1469_v49  ;;  %1502 = vmatpush3.bf16.msra.mxu0 %v1501_v52  ;;  %v738_v49 = vld [vmem:[%s2259_s9 + $0x228] sm:$0xff]  ;;  %v1511_v52 = vpack.c.bf16 %v754_v41, %v753_v38  ;;  %v793_v38 = vld [vmem:[%s2259_s9 + $0x3e0] sm:$0xff]  ;;  %v1525_v41 = vpack.c.bf16 %v744_v31, %v743_v30 }
 0x2b5   :  { %1504 = vmatprep.subr.bf16.mxu1 %v1503_v56  ;;  %1536 = vmatprep.subr.bf16.mxu0 %v1535_v58  ;;  %v755_v56 = vld [vmem:[%s2259_s9 + $0x2b0] sm:$0xff]  ;;  %v1192_v30 = vld [vmem:[%s2263_s12] ss:$0 sm:$0xff] }
 0x362   :  { %v443_v8 = vpop.f32.mrb[2].mxu1  ;;  %v514_v9 = vpop.f32.mrb[4].mxu0 }
 0x363   :  { %v444_v12 = vadd.f32 %v443_v8, %v337_v4  ;;  %v515_v13 = vadd.f32 %v514_v9, %v345_v5  ;;  %v445_v14 = vpop.f32.mrb[3].mxu1  ;;  %v516_v15 = vpop.f32.mrb[5].mxu0  ;;  %v1513_v4 = vpack.c.bf16 %v738_v49, %v737_v48  ;;  %v1545_v5 = vpack.c.bf16 %v770_v55, %v769_v54  ;;  %v796_v54 = vld [vmem:[%s2259_s9 + $0x3f8] sm:$0xff] }
 0x364   :  { %v446_v19 = vadd.f32 %v445_v14, %v341_v6  ;;  %v517_v20 = vadd.f32 %v516_v15, %v349_v7  ;;  %v739_v6 = vld [vmem:[%s2259_s9 + $0x230] sm:$0xff]  ;;  %v740_v7 = vld [vmem:[%s2259_s9 + $0x238] sm:$0xff]  ;;  %v1515_v8 = vpack.c.bf16 %v756_v59, %v755_v56  ;;  %v1547_v9 = vpack.c.bf16 %v788_v62, %v787_v61  ;;  %v789_v14 = vld [vmem:[%s2259_s9 + $0x3c0] sm:$0xff] }
 0x365   :  { %v661_v32 = vmax.f32 %v444_v12, 0.0  ;;  %v663_v33 = vmax.f32 %v515_v13, 0.0  ;;  %v757_v12 = vld [vmem:[%s2259_s9 + $0x2c0] sm:$0xff]  ;;  %v758_v13 = vld [vmem:[%s2259_s9 + $0x2c8] sm:$0xff]  ;;  %v1517_v16 = vpack.c.bf16 %v740_v7, %v739_v6  ;;  %v1527_v48 = vpack.c.bf16 %v762_v37, %v761_v36 }
 0x366   :  { %v662_v26 = vmax.f32 %v446_v19, 0.0  ;;  %v664_v27 = vmax.f32 %v517_v20, 0.0  ;;  %v790_v15 = vld [vmem:[%s2259_s9 + $0x3c8] sm:$0xff]  ;;  %v1519_v20 = vpack.c.bf16 %v758_v13, %v757_v12 }
 0x367   :  { %v742_v19 = vld [vmem:[%s2259_s9 + $0x248] sm:$0xff]  ;;  %v1551_v21 = vpack.c.bf16 %v790_v15, %v789_v14  ;;  %v1191_v15 = vld [vmem:[%s2262_s10] ss:$0 sm:$0xff] }
 0x368   :  { %868 = vmatprep.mubr.f32.mxu1 %v662_v26  ;;  %938 = vmatprep.mubr.f32.mxu0 %v664_v27  ;;  %v791_v26 = vld [vmem:[%s2259_s9 + $0x3d0] sm:$0xff]  ;;  %v792_v27 = vld [vmem:[%s2259_s9 + $0x3d8] sm:$0xff] }
 0x369   :  { %869 = vmatmul.mubr.f32.vlgmr.msra.gmra.mrb[6].mxu1 %v661_v32  ;;  %939 = vmatmul.mubr.f32.vlgmr.msra.gmra.mrb[8].mxu0 %v663_v33  ;;  %v1523_v32 = vpack.c.bf16 %v760_v25, %v759_v24  ;;  %v1555_v33 = vpack.c.bf16 %v792_v27, %v791_v26 }
 0x36a   :  { %v2083_v44 = vpop.f32.mrb[4].mxu1  ;;  %v2085_v45 = vpop.f32.mrb[6].mxu0  ;;  %1506 = vmatpush3.bf16.msra.mxu1 %v1505_v28  ;;  %1538 = vmatpush3.bf16.msra.mxu0 %v1537_v29  ;;  %v1521_v28 = vpack.c.bf16 %v742_v19, %v741_v18  ;;  %v1553_v29 = vpack.c.bf16 %v774_v23, %v773_v22 }
 0x36b   :  { %v587_v50 = vpop.f32.mrb[5].mxu1  ;;  %v658_v51 = vpop.f32.mrb[7].mxu0  ;;  %1508 = vmatprep.subr.bf16.mxu1 %v1507_v34  ;;  %1540 = vmatprep.subr.bf16.mxu0 %v1539_v35  ;;  %v775_v34 = vld [vmem:[%s2259_s9 + $0x350] sm:$0xff]  ;;  %v776_v35 = vld [vmem:[%s2259_s9 + $0x358] sm:$0xff] }
 0x36c   :  { %v588_v57 = vadd.f32 %v587_v50, %v357_v39  ;;  %v659_v58 = vadd.f32 %v658_v51, %v365_v40  ;;  %v794_v39 = vld [vmem:[%s2259_s9 + $0x3e8] sm:$0xff]  ;;  %v352_v40 = vsub.s32 4, %v2016_v60  ;;  %v1557_v42 = vpack.c.bf16 %v776_v35, %v775_v34  ;;  %v777_v50 = vld [vmem:[%s2259_s9 + $0x360] sm:$0xff] }
 0x36d   :  { %v1559_v49 = vpack.c.bf16 %v794_v39, %v793_v38  ;;  %v778_v51 = vld [vmem:[%s2259_s9 + $0x368] sm:$0xff] }
 0x36e   :  { %v666_v1 = vmax.f32 %v588_v57, 0.0  ;;  %v668_v2 = vmax.f32 %v659_v58, 0.0  ;;  %1510 = vmatpush3.bf16.msra.mxu1 %v1509_v46  ;;  %1542 = vmatpush3.bf16.msra.mxu0 %v1541_v47  ;;  %v746_v46 = vld [vmem:[%s2259_s9 + $0x268] sm:$0xff]  ;;  %v360_v47 = vsub.s32 6, %v2016_v60  ;;  %v764_v60 = vld [vmem:[%s2259_s9 + $0x2f8] sm:$0xff]  ;;  %v353_v55 = vrot.slane %v2023_v63, %v352_v40  ;;  %v747_v58 = vld [vmem:[%s2259_s9 + $0x270] sm:$0xff] }
 0x36f   :  { %1512 = vmatprep.subr.bf16.mxu1 %v1511_v52  ;;  %1544 = vmatprep.subr.bf16.mxu0 %v1543_v53  ;;  %v763_v52 = vld [vmem:[%s2259_s9 + $0x2f0] sm:$0xff]  ;;  %v1529_v56 = vpack.c.bf16 %v746_v46, %v745_v43  ;;  %v1561_v57 = vpack.c.bf16 %v778_v51, %v777_v50 }
 0x370   :  { %1008 = vmatprep.mubr.f32.mxu1 %v666_v1  ;;  %1078 = vmatprep.mubr.f32.mxu0 %v668_v2  ;;  %v795_v53 = vld [vmem:[%s2259_s9 + $0x3f0] sm:$0xff]  ;;  %v361_v59 = vrot.slane %v2023_v63, %v360_v47  ;;  %v1531_v61 = vpack.c.bf16 %v764_v60, %v763_v52  ;;  %v748_v1 = vld [vmem:[%s2259_s9 + $0x278] sm:$0xff]  ;;  %v586_v6 = vadd.f32 %v2083_v44, %v353_v55  ;;  %v1086_v44 = vld [vmem:[%s2261_s11 + $0x8] sm:$0xff] }
 0x371   :  { %v1563_v62 = vpack.c.bf16 %v796_v54, %v795_v53  ;;  %v779_v2 = vld [vmem:[%s2259_s9 + $0x370] sm:$0xff] }
 0x372   :  { %1514 = vmatpush3.bf16.msra.mxu1 %v1513_v4  ;;  %1546 = vmatpush3.bf16.msra.mxu0 %v1545_v5  ;;  %v780_v4 = vld [vmem:[%s2259_s9 + $0x378] sm:$0xff]  ;;  %v1533_v5 = vpack.c.bf16 %v748_v1, %v747_v58  ;;  %v657_v7 = vadd.f32 %v2085_v45, %v361_v59  ;;  %v1568_v45 = vpack.c.bf16 %v1086_v44, %v1085_v10 }
 0x373   :  { %1516 = vmatprep.subr.bf16.mxu1 %v1515_v8  ;;  %1548 = vmatprep.subr.bf16.mxu0 %v1547_v9  ;;  %v1565_v63 = vpack.c.bf16 %v780_v4, %v779_v2  ;;  %v665_v8 = vmax.f32 %v586_v6, 0.0 }
 0x374   :  { %v667_v9 = vmax.f32 %v657_v7, 0.0 }
 0x376   :  { %1518 = vmatpush3.bf16.msra.mxu1 %v1517_v16  ;;  %1550 = vmatpush3.bf16.msra.mxu0 %v1549_v17 }
 0x377   :  { %1520 = vmatprep.subr.bf16.mxu1 %v1519_v20  ;;  %1552 = vmatprep.subr.bf16.mxu0 %v1551_v21 }
 0x37a   :  { %1522 = vmatpush3.bf16.msra.mxu1 %v1521_v28  ;;  %1554 = vmatpush3.bf16.msra.mxu0 %v1553_v29 }
 0x37b   :  { %1524 = vmatprep.subr.bf16.mxu1 %v1523_v32  ;;  %1556 = vmatprep.subr.bf16.mxu0 %v1555_v33 }
 0x37e   :  { %1526 = vmatpush3.bf16.msra.mxu1 %v1525_v41  ;;  %1558 = vmatpush3.bf16.msra.mxu0 %v1557_v42 }
 0x37f   :  { %1528 = vmatprep.subr.bf16.mxu1 %v1527_v48  ;;  %1560 = vmatprep.subr.bf16.mxu0 %v1559_v49 }
 0x382   :  { %1530 = vmatpush3.bf16.msra.mxu1 %v1529_v56  ;;  %1562 = vmatpush3.bf16.msra.mxu0 %v1561_v57 }
 0x383   :  { %1532 = vmatprep.subr.bf16.mxu1 %v1531_v61  ;;  %1564 = vmatprep.subr.bf16.mxu0 %v1563_v62 }
 0x386   :  { %1534 = vmatpush3.bf16.msra.mxu1 %v1533_v5  ;;  %1566 = vmatpush3.bf16.msra.mxu0 %v1565_v63 }
 0x387   :  { %1567 = vmatprep.subr.bf16.mxu1 %v1580_v0 }
 0x389   :  { %1009 = vmatmul.mubr.f32.vlgmr.msra.gmra.mrb[8].mxu1 %v665_v8  ;;  %1079 = vmatmul.mubr.f32.vlgmr.msra.gmra.mrb[10].mxu0 %v667_v9 }
 0x38a   :  { %1389 = vmatprep.mubr.msk.f32.mxu1 %vm1581_vm0, %v1582_v3  ;;  %1569 = vmatpush3.bf16.msra.mxu1 %v1568_v45  ;;  %v1088_v3 = vld [vmem:[%s2261_s11 + $0x18] sm:$0xff] }
 0x38b   :  { %1570 = vmatprep.subr.bf16.mxu1 %v1580_v0  ;;  %v1571_v12 = vpack.c.bf16 %v1088_v3, %v1087_v11 }
 0x38e   :  { %1572 = vmatpush3.bf16.msra.mxu1 %v1571_v12 }
 0x43c   :  { %v1239_v13 = vpop.f32.mrb[6].mxu1  ;;  %v1274_v14 = vpop.f32.mrb[8].mxu0 }
 0x43d   :  { %v1240_v16 = vpop.f32.mrb[7].mxu1  ;;  %v1275_v17 = vpop.f32.mrb[9].mxu0 }
 0x43e   :  { %v1241_v18 = vadd.f32 %v1240_v16, %v1239_v13  ;;  %v1276_v0 = vadd.f32 %v1275_v17, %v1274_v14 }
 0x440   :  { %v871_v19 = vadd.f32 %v1241_v18, %v1191_v15 }
 0x442   :  { %v941_v20 = vadd.f32 %v1276_v0, %v871_v19 }
 0x45c   :  { %v1309_v21 = vpop.f32.mrb[8].mxu1  ;;  %v1344_v22 = vpop.f32.mrb[10].mxu0 }
 0x45d   :  { %v1310_v23 = vpop.f32.mrb[9].mxu1  ;;  %v1345_v24 = vpop.f32.mrb[11].mxu0 }
 0x45e   :  { %v1311_v25 = vadd.f32 %v1310_v23, %v1309_v21  ;;  %v1346_v26 = vadd.f32 %v1345_v24, %v1344_v22 }
 0x460   :  { %v1011_v27 = vadd.f32 %v1311_v25, %v941_v20 }
 0x462   :  { %v1081_v28 = vadd.f32 %v1346_v26, %v1011_v27 }
 0x464   :  { %v1084_v29 = vmax.f32 %v1081_v28, 0.0 }
 0x466   :  { %1390 = vmatmul.mubr.msk.f32.vlgmr.msra.gmra.mrb[10].mxu1 %vm140_vm2, %v1084_v29 }
 0x539   :  { %v1165_v31 = vpop.f32.mrb[10].mxu1 }
 0x53a   :  { %v1166_v32 = vadd.f32 %v1192_v30, %v1165_v31  ;;  %v1391_v33 = vpop.f32.mrb[11].mxu1 }
 0x53c   :  { %v1169_v34 = vsub.f32 0.0, %v1166_v32 }
 0x53e   :  { %v1170_v35 = vmul.f32 1.442695, %v1169_v34 }
 0x540   :  { %1576 = vpow2.f32 %v1170_v35 }
 0x54a   :  { %v1577_v36 = vpop.eup %1576 }
 0x54b   :  { %v1172_v37 = vadd.f32 1.0, %v1577_v36 }
 0x54d   :  { %1578 = vrcp.f32 %v1172_v37 }
 0x557   :  { %v1579_v38 = vpop.eup %1578 }
 0x558   :  { %1176 = vst.msk [vmem:[%s2264_s13] sm:$0xff] %vm1175_vm3, %v1579_v38 }

</bundles_post_ra>
